<compile_context>
chip_gen: v6e
topology: v6e:2x2x1
jax: 0.10.0
libtpu: 0.0.40
codegen_flags: <defaults>
</compile_context>

<pallas_src>
import jax
import jax.numpy as jnp
from jax.experimental import pallas as pl
from jax.experimental.pallas import tpu as pltpu


# ----------------------------------------------------------------------------
# Kernel 1: quantize -> (generator stand-in) -> dequantize, elementwise.
# ----------------------------------------------------------------------------
def _simswap_noise_kernel(img_ref, out_ref):
    # Keep the quantization arithmetic in f32 even if HBM I/O is narrowed later.
    x = img_ref[...].astype(jnp.float32)

    # single_image = ((image[i].clamp(-1,1).permute(1,2,0)+1)/2*255)
    #                   .add(0.5).clamp(0,255).to(uint8)
    # (permute only changes layout; values are elementwise, layout kept as-is.)
    x = jnp.clip(x, -1.0, 1.0)
    u = jnp.floor(jnp.clip((x + 1.0) * (0.5 * 255.0) + 0.5, 0.0, 255.0))  # 0..255 codes

    # img_att = ToTensor(uint8) = u/255;
    # TODO(synk): img_fake = self.model(img_att, img_id, latend_id, latend_id, True)
    #   -- SimSwap generator + netArc are external pretrained networks; with the
    #   identity stand-in, the second quantize chain
    #       q = floor(clip(clip(img_fake,0,1)*255 + 0.5, 0, 255))
    #   reproduces `u` exactly, so it is folded away here (restore it together
    #   with the real generator).  PNG write/read is lossless and the BGR/RGB
    #   flips cancel, so they are value no-ops.
    #
    # ToTensor + Normalize([0.5]*3,[0.5]*3):  (u/255 - 0.5)/0.5
    out_ref[...] = (u * (2.0 / 255.0) - 1.0).astype(out_ref.dtype)


def simswap_noise(image, *, block_rows=512, lane_cols=1024):
    """image: float32 NCHW in ~[-1, 1] -> noised_image: float32 NCHW."""
    orig_shape = image.shape
    flat = image.reshape(-1)
    total = flat.shape[0]

    # Lane-dense 2D layout: last dim a multiple of 128 (prefer 1024 = 8 * 128).
    cols = lane_cols if total >= lane_cols else 128
    rows = pl.cdiv(total, cols)

    # Row-tile: full array if small, otherwise a multiple of 8 sublanes.
    br = min(block_rows, rows)
    if rows > br and br % 8 != 0:
        br = max(8, (br // 8) * 8)
    rows_p = pl.cdiv(rows, br) * br

    pad = rows_p * cols - total
    flat_p = jnp.pad(flat, (0, pad)) if pad else flat
    x2d = flat_p.reshape(rows_p, cols)

    out2d = pl.pallas_call(
        _simswap_noise_kernel,
        out_shape=jax.ShapeDtypeStruct((rows_p, cols), image.dtype),
        grid_spec=pltpu.PrefetchScalarGridSpec(
            num_scalar_prefetch=0,
            grid=(rows_p // br,),
            in_specs=[pl.BlockSpec((br, cols), lambda i: (i, 0))],
            out_specs=pl.BlockSpec((br, cols), lambda i: (i, 0)),
        ),
        compiler_params=pltpu.CompilerParams(
            dimension_semantics=("parallel",),
            vmem_limit_bytes=32 << 20,
        ),
    )(x2d)

    return out2d.reshape(-1)[:total].reshape(orig_shape)


# ----------------------------------------------------------------------------
# Kernel 2: latend_id = latend_id / np.linalg.norm(latend_id, axis=1, keepdims=True)
# ----------------------------------------------------------------------------
def _l2norm_kernel(lat_ref, out_ref):
    x = lat_ref[...].astype(jnp.float32)
    inv_norm = jax.lax.rsqrt(jnp.sum(x * x, axis=-1, keepdims=True))
    out_ref[...] = (x * inv_norm).astype(out_ref.dtype)


def l2_normalize_latent(latent, *, rows_per_block=256):
    """latent: (B, D) float32 -> row-wise L2-normalized latent.

    D is kept whole along the lane axis (ArcFace D=512 = 4*128); rows are
    tiled so large batches stay pipelined and within VMEM.
    """
    B, D = latent.shape
    rb = min(rows_per_block, B)
    if B > rb and rb % 8 != 0:
        rb = max(8, (rb // 8) * 8)
    Bp = pl.cdiv(B, rb) * rb
    lat_p = jnp.pad(latent, ((0, Bp - B), (0, 0))) if Bp != B else latent

    out = pl.pallas_call(
        _l2norm_kernel,
        out_shape=jax.ShapeDtypeStruct((Bp, D), latent.dtype),
        grid_spec=pltpu.PrefetchScalarGridSpec(
            num_scalar_prefetch=0,
            grid=(Bp // rb,),
            in_specs=[pl.BlockSpec((rb, D), lambda i: (i, 0))],
            out_specs=pl.BlockSpec((rb, D), lambda i: (i, 0)),
        ),
        compiler_params=pltpu.CompilerParams(
            dimension_semantics=("parallel",),
            vmem_limit_bytes=32 << 20,
        ),
    )(lat_p)
    return out[:B]


# ----------------------------------------------------------------------------
# Pure-JAX reference (keeps the FULL quantize -> dequantize chain) for checks.
# ----------------------------------------------------------------------------
def _simswap_noise_ref(image):
    x = jnp.clip(image, -1.0, 1.0)
    u = jnp.floor(jnp.clip((x + 1.0) * 0.5 * 255.0 + 0.5, 0.0, 255.0))
    att = u / 255.0
    fake = att  # identity stand-in for the external generator
    q = jnp.floor(jnp.clip(jnp.clip(fake, 0.0, 1.0) * 255.0 + 0.5, 0.0, 255.0))
    return q * (2.0 / 255.0) - 1.0


if __name__ == "__main__":
    key = jax.random.PRNGKey(0)
    k_img, k_cov, k_lat = jax.random.split(key, 3)

    # image_cover_mask = (image, cover_image); cover_image is unused by forward().
    N, C, H, W = 2, 3, 16, 16
    image = jax.random.uniform(k_img, (N, C, H, W), jnp.float32, -1.2, 1.2)
    cover_image = jax.random.uniform(k_cov, (N, C, H, W), jnp.float32, -1.0, 1.0)
    image_cover_mask = (image, cover_image)

    # TODO(synk): latend_id would come from self.model.netArc(F.interpolate(img_id,(112,112)));
    # a deterministic synthetic latent stands in for the external ArcFace output.
    latent = jax.random.normal(k_lat, (N, 512), jnp.float32)

    # Reference computed before the kernel runs.
    ref = _simswap_noise_ref(image)

    noised_image = simswap_noise(image_cover_mask[0])
    latend_id = l2_normalize_latent(latent)

    jax.block_until_ready(noised_image)
    jax.block_until_ready(latend_id)

    # Correctness checks.
    assert noised_image.shape == image.shape
    assert jnp.max(jnp.abs(noised_image - ref)) < 1e-5
    assert jnp.max(jnp.abs(jnp.sum(latend_id * latend_id, axis=1) - 1.0)) < 1e-4

    print("KERNEL_OK")
</pallas_src>

<mosaic_0001>
module attributes {stable_mosaic.version = 11 : i64} {
  func.func @_simswap_noise_kernel(%arg0: i32, %arg1: memref<2x1024xf32, #tpu.memory_space<vmem>>, %arg2: memref<2x1024xf32, #tpu.memory_space<vmem>>) attributes {dimension_semantics = [#tpu.dimension_semantics<parallel>], iteration_bounds = array<i64: 1>, scalar_prefetch = 0 : i64, scratch_operands = 0 : i64, tpu.core_type = #tpu.core_type<tc>, window_params = [{transform_indices = @transform_0, window_bounds = array<i64: 2, 1024>}, {transform_indices = @transform_1, window_bounds = array<i64: 2, 1024>}]} {
    %c0 = arith.constant 0 : index
    %c0_0 = arith.constant 0 : index
    %0 = vector.load %arg1[%c0, %c0_0] : memref<2x1024xf32, #tpu.memory_space<vmem>>, vector<2x1024xf32>
    %cst = arith.constant -1.000000e+00 : f32
    %cst_1 = arith.constant 1.000000e+00 : f32
    %1 = vector.broadcast %cst : f32 to vector<2x1024xf32>
    %2 = arith.maximumf %1, %0 : vector<2x1024xf32>
    %3 = vector.broadcast %cst_1 : f32 to vector<2x1024xf32>
    %4 = arith.minimumf %3, %2 : vector<2x1024xf32>
    %cst_2 = arith.constant 1.000000e+00 : f32
    %5 = vector.broadcast %cst_2 : f32 to vector<2x1024xf32>
    %6 = arith.addf %4, %5 : vector<2x1024xf32>
    %cst_3 = arith.constant 1.275000e+02 : f32
    %7 = vector.broadcast %cst_3 : f32 to vector<2x1024xf32>
    %8 = arith.mulf %6, %7 : vector<2x1024xf32>
    %cst_4 = arith.constant 5.000000e-01 : f32
    %9 = vector.broadcast %cst_4 : f32 to vector<2x1024xf32>
    %10 = arith.addf %8, %9 : vector<2x1024xf32>
    %cst_5 = arith.constant 0.000000e+00 : f32
    %cst_6 = arith.constant 2.550000e+02 : f32
    %11 = vector.broadcast %cst_5 : f32 to vector<2x1024xf32>
    %12 = arith.maximumf %11, %10 : vector<2x1024xf32>
    %13 = vector.broadcast %cst_6 : f32 to vector<2x1024xf32>
    %14 = arith.minimumf %13, %12 : vector<2x1024xf32>
    %15 = math.floor %14 : vector<2x1024xf32>
    %cst_7 = arith.constant 0.00784313772 : f32
    %16 = vector.broadcast %cst_7 : f32 to vector<2x1024xf32>
    %17 = arith.mulf %15, %16 : vector<2x1024xf32>
    %cst_8 = arith.constant 1.000000e+00 : f32
    %18 = vector.broadcast %cst_8 : f32 to vector<2x1024xf32>
    %19 = arith.subf %17, %18 : vector<2x1024xf32>
    %c0_9 = arith.constant 0 : index
    %c0_10 = arith.constant 0 : index
    %20 = vector.load %arg2[%c0_9, %c0_10] : memref<2x1024xf32, #tpu.memory_space<vmem>>, vector<2x1024xf32>
    tpu.vector_store %arg2[%c0_9, %c0_10], %19 {strides = array<i32>} : memref<2x1024xf32, #tpu.memory_space<vmem>>, vector<2x1024xf32>,
    return
  }
  func.func @transform_0(%arg0: i32) -> (i32, i32) {
    %c0_i32 = arith.constant 0 : i32
    %c0_i32_0 = arith.constant 0 : i32
    return %arg0, %c0_i32 : i32, i32
  }
  func.func @transform_1(%arg0: i32) -> (i32, i32) {
    %c0_i32 = arith.constant 0 : i32
    %c0_i32_0 = arith.constant 0 : i32
    return %arg0, %c0_i32 : i32, i32
  }
}

</mosaic_0001>

<bundles_post_ra>
// kernel: tpu_custom_call.1
= control target key start
LH: loop header
LB: loop body
LE: loop exit
PB: predicated region body
PF: predicated region fallthrough
CT: control target
= control target key end

     0   :  { %6 = vsyncpa [#allocation3], 0  ;;  %s128_s0 = inlined_call_operand.hbm [shape: f32[2,1024], index: 0, kind: input, shape index: {}]   ;;  %s129_s1 = inlined_call_operand.hbm [shape: f32[2,1024], index: 1, kind: output, shape index: {}]  }
   0x1   :  { %7 = vsyncpa [#allocation4], 0  ;;  %s110_s6 = smov [#allocation2]  }
   0x2   :  { %s14_s7 = sshll.u32 %s110_s6, 4  ;;  %s15_s7 = int_to_ptr.vmem [resolvable:$true] %s14_s7 }
   0x3   :  { %s74_s8 = scalar_lea.vmem %s15_s7, 256  ;;  %p79_p1 = scmp.lt.s32.totalorder %s15_s7, %s15_s7 }
   0x4   :  { %p75_p0 = scmp.ne.s32.totalorder %s15_s7, %s74_s8  ;;  %p80_p2 = scmp.lt.s32.totalorder %s74_s8, %s74_s8 }
   0x6   :  { %p81_p3 = por %p80_p2, %p79_p1 }
   0x8   :  { %p82_p4 = pnand %p81_p3, %p75_p0 }
   0xa   :  { %85 = shalt.err (!%p82_p4)
}
   0xb   :  { %17 = dma.hbm_to_vmem [thread:$0]  %s128_s0, 256, %s15_s7, [#allocation3]  }
   0xc   :  { %106 = dma.done.wait [#allocation3], 256  }
   0xd   :  { %107 = vsyncadd [#allocation3], 4294967040  ;;  %v21_v0 = vld [vmem:[#allocation2] sm:$0xff]  ;;  %v22_v1 = vld [vmem:[#allocation2 + $0x8] sm:$0xff]  ;;  %s111_s11 = smov [#allocation5]  }
   0xe   :  { %v60_v2 = vclamps-f32 %v21_v0, 1.0  ;;  %v61_v3 = vclamps-f32 %v22_v1, 1.0  ;;  %s51_s0 = sshll.u32 %s111_s11, 4  ;;  %s52_s0 = int_to_ptr.vmem [resolvable:$true] %s51_s0 }
   0xf   :  { %s86_s12 = scalar_lea.vmem %s52_s0, 256  ;;  %p91_p6 = scmp.lt.s32.totalorder %s52_s0, %s52_s0 }
  0x10   :  { %v27_v4 = vadd.f32 1.0, %v60_v2  ;;  %v28_v5 = vadd.f32 1.0, %v61_v3  ;;  %p87_p5 = scmp.ne.s32.totalorder %s52_s0, %s86_s12  ;;  %p92_p7 = scmp.lt.s32.totalorder %s86_s12, %s86_s12 }
  0x12   :  { %v29_v6 = vmul.f32 127.5, %v27_v4  ;;  %v30_v7 = vmul.f32 127.5, %v28_v5  ;;  %p93_p8 = por %p92_p7, %p91_p6 }
  0x14   :  { %v31_v8 = vadd.f32 0.5, %v29_v6  ;;  %v32_v9 = vadd.f32 0.5, %v30_v7  ;;  %p94_p9 = pnand %p93_p8, %p87_p5 }
  0x16   :  { %v33_v10 = vmax.f32 %v31_v8, 0.0  ;;  %v34_v11 = vmax.f32 %v32_v9, 0.0 }
  0x18   :  { %v35_v12 = vmin.f32 %v33_v10, 255.0  ;;  %v36_v13 = vmin.f32 %v34_v11, 255.0 }
  0x1a   :  { %v37_v14 = vfloor.f32 %v35_v12  ;;  %v38_v15 = vfloor.f32 %v36_v13 }
  0x1c   :  { %v39_v16 = vmul.f32 0.007843138, %v37_v14  ;;  %v40_v17 = vmul.f32 0.007843138, %v38_v15 }
  0x1e   :  { %v62_v18 = vadd.f32 -1.0, %v39_v16  ;;  %v63_v19 = vadd.f32 -1.0, %v40_v17 }
  0x20   :  { %43 = vst [vmem:[#allocation5] sm:$0xff] %v62_v18  ;;  %44 = vst [vmem:[#allocation5 + $0x8] sm:$0xff] %v63_v19 }
  0x21   :  { %97 = shalt.err (!%p94_p9)
}
  0x22   :  { %54 = dma.vmem_to_hbm [thread:$0]  %s52_s0, 256, %s129_s1, [#allocation4]  }
  0x23   :  { %108 = dma.done.wait [#allocation4], 256  }
  0x24   :  { %109 = vsyncadd [#allocation4], 4294967040 }
  0x25   :  { %58 = vsyncpa [#allocation3], 1 }
  0x26   :  { %59 = vsyncpa [#allocation4], 1 }

</bundles_post_ra>
